<compile_context>
chip_gen: v7x
topology: tpu7x:2x2x1
jax: 0.10.0
libtpu: 0.0.40
codegen_flags: <defaults>
</compile_context>

<pallas_src>
import functools

import jax
import jax.numpy as jnp
from jax import lax
from jax.experimental import pallas as pl
from jax.experimental.pallas import tpu as pltpu


def _binconvt_phase_kernel(x_ref, w_ref, o_ref, *, T_h, T_w, M_h, M_w):
    # x_ref : (1, H_pad, W_pad, Cin)  bf16, sign(x) already applied + zero padded
    # w_ref : (1, K, Cout)            bf16 weight slab of this phase, K = T_h*T_w*Cin
    # o_ref : (1, 1, P, Cout)         P = M_h*M_w
    xs = x_ref[0]                                        # (H_pad, W_pad, Cin)

    # Hoist the W-axis (sublane) shifts: only T_w relayouts, reused across t_h.
    w_shift = [xs[:, tw:tw + M_w, :] for tw in range(T_w)]

    # im2col: gather the T_h*T_w taps into the contraction (lane) axis.
    cols = []
    for th in range(T_h):
        for tw in range(T_w):
            cols.append(w_shift[tw][th:th + M_h])        # (M_h, M_w, Cin), cheap H slice
    patches = jnp.concatenate(cols, axis=-1)             # (M_h, M_w, K)
    patches = patches.reshape(M_h * M_w, -1)             # (P, K)

    # One MXU matmul per (batch, phase) grid step; f32 accumulate.
    y = jnp.dot(patches, w_ref[0], preferred_element_type=jnp.float32)  # (P, Cout)
    o_ref[0, 0] = jnp.maximum(y, 0.0).astype(o_ref.dtype)


def _phase_geometry(k, p, s, n_in, n_out):
    """1-D sub-pixel decomposition bookkeeping for one spatial axis."""
    ph = k - 1 - p                                  # pad of the virtual dilated input
    d = [(ph - r) // s for r in range(s)]
    c = [(ph - r) % s for r in range(s)]
    q = [max(0, -(-(k - c[r]) // s)) for r in range(s)]      # taps of phase r
    big_d = max(d)
    t = max(1, max(big_d - d[r] + q[r] for r in range(s)))   # uniform tap count
    m = -(-n_out // s)                              # outputs per phase (padded uniform)
    pad_lo = big_d
    pad_hi = max(0, (m + t - 1) - big_d - n_in)
    return dict(d=d, c=c, q=q, D=big_d, T=t, M=m, pad_lo=pad_lo, pad_hi=pad_hi)


def bin_conv_transpose2d(x_nchw, weight, *, stride=1, padding=0):
    """ReLU(conv_transpose2d(sign(x), weight, stride, padding, bias=False)).

    x_nchw: (N, Cin, H, W); weight: (Cin, Cout, kH, kW)  (PyTorch layouts).
    """
    # TODO(synk): the batchnorm=True constructor branch is not implemented
    # (module defaults are batchnorm=False, bias=False).
    N, Cin, H, W = x_nchw.shape
    Cin_w, Cout, kH, kW = weight.shape
    assert Cin == Cin_w
    s = int(stride)
    assert padding <= kH - 1 and padding <= kW - 1, "crop-style padding not supported"

    H_out = (H - 1) * s - 2 * padding + kH
    W_out = (W - 1) * s - 2 * padding + kW

    gh = _phase_geometry(kH, padding, s, H, H_out)
    gw = _phase_geometry(kW, padding, s, W, W_out)
    T_h, T_w, M_h, M_w = gh["T"], gw["T"], gh["M"], gw["M"]
    K = T_h * T_w * Cin
    P = M_h * M_w

    # ---- per-phase weight slabs (s*s, K, Cout), taps already spatially flipped ----
    w_sub = jnp.zeros((s, s, T_h, T_w, Cin, Cout), jnp.float32)
    for ry in range(s):
        for th in range(T_h):
            qh = th - (gh["D"] - gh["d"][ry])
            if not (0 <= qh < gh["q"][ry]):
                continue
            kh_f = qh * s + gh["c"][ry]             # index into the flipped kernel
            for rx in range(s):
                for tw in range(T_w):
                    qw = tw - (gw["D"] - gw["d"][rx])
                    if not (0 <= qw < gw["q"][rx]):
                        continue
                    kw_f = qw * s + gw["c"][rx]
                    w_sub = w_sub.at[ry, rx, th, tw].set(
                        weight[:, :, kH - 1 - kh_f, kW - 1 - kw_f].astype(jnp.float32))
    w_sub = w_sub.reshape(s * s, K, Cout).astype(jnp.bfloat16)

    # ---- binarized, NHWC, zero-padded input (no zero-dilation, bf16 in HBM) -------
    xs = jnp.sign(x_nchw).astype(jnp.bfloat16)      # {-1,0,+1}: exact in bf16
    xs = jnp.transpose(xs, (0, 2, 3, 1))            # NCHW -> NHWC
    x_pad = jnp.pad(xs, ((0, 0),
                         (gh["pad_lo"], gh["pad_hi"]),
                         (gw["pad_lo"], gw["pad_hi"]),
                         (0, 0)))
    H_pad, W_pad = x_pad.shape[1], x_pad.shape[2]

    kernel = functools.partial(_binconvt_phase_kernel,
                               T_h=T_h, T_w=T_w, M_h=M_h, M_w=M_w)

    out = pl.pallas_call(
        kernel,
        out_shape=jax.ShapeDtypeStruct((N, s * s, P, Cout), x_nchw.dtype),
        grid_spec=pltpu.PrefetchScalarGridSpec(
            num_scalar_prefetch=0,
            grid=(N, s * s),
            in_specs=[
                # Un-dilated padded image per batch element; the block index is
                # constant across the (inner) phase axis, so it stays VMEM-resident.
                pl.BlockSpec((1, H_pad, W_pad, Cin), lambda n, ph: (n, 0, 0, 0)),
                # One contiguous 2D (K, Cout) weight slab per phase.
                pl.BlockSpec((1, K, Cout), lambda n, ph: (ph, 0, 0)),
            ],
            out_specs=pl.BlockSpec((1, 1, P, Cout), lambda n, ph: (n, ph, 0, 0)),
        ),
        compiler_params=pltpu.CompilerParams(
            dimension_semantics=("parallel", "parallel"),
            vmem_limit_bytes=32 * 1024 * 1024),
    )(x_pad, w_sub)
    # TODO(synk): for very large images add a halo'd spatial output-tile grid axis so
    # one image block never approaches the v7x 64 MiB VMEM budget.

    # ---- interleave the s*s phase grids back into (H_out, W_out) ------------------
    out = out.reshape(N, s, s, M_h, M_w, Cout)
    out = jnp.transpose(out, (0, 3, 1, 4, 2, 5))    # (N, M_h, s, M_w, s, Cout)
    out = out.reshape(N, M_h * s, M_w * s, Cout)[:, :H_out, :W_out, :]
    return jnp.transpose(out, (0, 3, 1, 2))         # NHWC -> NCHW


def _reference(x_nchw, weight, *, stride, padding):
    """Pure-JAX reference: ReLU(conv_transpose(sign(x)))."""
    xs = jnp.sign(x_nchw)
    w_oihw = jnp.transpose(weight[:, :, ::-1, ::-1], (1, 0, 2, 3))  # (Cout, Cin, kH, kW)
    kH, kW = weight.shape[2], weight.shape[3]
    y = lax.conv_general_dilated(
        xs, w_oihw,
        window_strides=(1, 1),
        padding=[(kH - 1 - padding,) * 2, (kW - 1 - padding,) * 2],
        lhs_dilation=(stride, stride),
        dimension_numbers=("NCHW", "OIHW", "NCHW"),
    )
    return jnp.maximum(y, 0.0)


if __name__ == "__main__":
    key = jax.random.PRNGKey(0)

    configs = [
        # (N, Cin, H,  W,  Cout, k, stride, padding)
        (2, 4, 16, 16, 8, 3, 2, 1),   # typical decoder upsample block
        (2, 4, 8, 8, 8, 4, 2, 1),     # even kernel (exercises the offset/extra-tap path)
        (1, 4, 8, 8, 8, 3, 1, 1),     # stride-1 degenerates to a plain conv
    ]
    for (N, Cin, H, W, Cout, ksz, stride, padding) in configs:
        key, kx, kw = jax.random.split(key, 3)
        x = jax.random.normal(kx, (N, Cin, H, W), dtype=jnp.float32)
        # ConvTranspose2d.weight shape: (in_ch, out_ch, kH, kW)
        weight = 0.1 * jax.random.normal(kw, (Cin, Cout, ksz, ksz), dtype=jnp.float32)

        y = jax.block_until_ready(
            bin_conv_transpose2d(x, weight, stride=stride, padding=padding))

        # Tight check against a reference using the same bf16-quantized weights
        # (validates the kernel math itself).
        w_q = weight.astype(jnp.bfloat16).astype(jnp.float32)
        y_ref_q = _reference(x, w_q, stride=stride, padding=padding)
        assert y.shape == y_ref_q.shape, (y.shape, y_ref_q.shape)
        assert jnp.allclose(y, y_ref_q, atol=1e-3, rtol=1e-3), (
            float(jnp.max(jnp.abs(y - y_ref_q))))

        # Module-semantics check (f32 weights); tolerance covers the bf16 weight cast.
        y_ref = _reference(x, weight, stride=stride, padding=padding)
        assert jnp.allclose(y, y_ref, atol=3e-2, rtol=3e-2), (
            float(jnp.max(jnp.abs(y - y_ref))))

    print("KERNEL_OK")
</pallas_src>

<mosaic_0001>
module attributes {stable_mosaic.version = 11 : i64} {
  func.func @_binconvt_phase_kernel(%arg0: i32, %arg1: i32, %arg2: memref<1x17x17x4xbf16, #tpu.memory_space<vmem>>, %arg3: memref<1x16x8xbf16, #tpu.memory_space<vmem>>, %arg4: memref<1x1x256x8xf32, #tpu.memory_space<vmem>>) attributes {dimension_semantics = [#tpu.dimension_semantics<parallel>, #tpu.dimension_semantics<parallel>], iteration_bounds = array<i64: 2, 4>, scalar_prefetch = 0 : i64, scratch_operands = 0 : i64, tpu.core_type = #tpu.core_type<tc>, window_params = [{transform_indices = @transform_0, window_bounds = array<i64: 1, 17, 17, 4>}, {transform_indices = @transform_1, window_bounds = array<i64: 1, 16, 8>}, {transform_indices = @transform_2, window_bounds = array<i64: 1, 1, 256, 8>}]} {
    %c0 = arith.constant 0 : index
    %c0_0 = arith.constant 0 : index
    %c0_1 = arith.constant 0 : index
    %c0_2 = arith.constant 0 : index
    %0 = vector.load %arg2[%c0, %c0_0, %c0_1, %c0_2] : memref<1x17x17x4xbf16, #tpu.memory_space<vmem>>, vector<1x17x17x4xbf16>
    %1 = vector.shape_cast %0 : vector<1x17x17x4xbf16> to vector<17x17x4xbf16>
    %2 = vector.extract_strided_slice %1 {offsets = [0, 0, 0], sizes = [17, 16, 4], strides = [1, 1, 1]} : vector<17x17x4xbf16> to vector<17x16x4xbf16>
    %3 = vector.extract_strided_slice %1 {offsets = [0, 1, 0], sizes = [17, 16, 4], strides = [1, 1, 1]} : vector<17x17x4xbf16> to vector<17x16x4xbf16>
    %4 = vector.extract_strided_slice %2 {offsets = [0, 0, 0], sizes = [16, 16, 4], strides = [1, 1, 1]} : vector<17x16x4xbf16> to vector<16x16x4xbf16>
    %5 = vector.extract_strided_slice %3 {offsets = [0, 0, 0], sizes = [16, 16, 4], strides = [1, 1, 1]} : vector<17x16x4xbf16> to vector<16x16x4xbf16>
    %6 = vector.extract_strided_slice %2 {offsets = [1, 0, 0], sizes = [16, 16, 4], strides = [1, 1, 1]} : vector<17x16x4xbf16> to vector<16x16x4xbf16>
    %7 = vector.extract_strided_slice %3 {offsets = [1, 0, 0], sizes = [16, 16, 4], strides = [1, 1, 1]} : vector<17x16x4xbf16> to vector<16x16x4xbf16>
    %8 = tpu.concatenate %4, %5, %6, %7 in 2 : vector<16x16x4xbf16>, vector<16x16x4xbf16>, vector<16x16x4xbf16>, vector<16x16x4xbf16> -> vector<16x16x16xbf16>
    %9 = vector.shape_cast %8 : vector<16x16x16xbf16> to vector<256x16xbf16>
    %c0_3 = arith.constant 0 : index
    %c0_4 = arith.constant 0 : index
    %c0_5 = arith.constant 0 : index
    %10 = vector.load %arg3[%c0_3, %c0_4, %c0_5] : memref<1x16x8xbf16, #tpu.memory_space<vmem>>, vector<1x16x8xbf16>
    %11 = vector.shape_cast %10 : vector<1x16x8xbf16> to vector<16x8xbf16>
    %cst = arith.constant dense<0.000000e+00> : vector<256x8xf32>
    %12 = tpu.matmul %9, %11, %cst {dimension_numbers = #tpu.dot_dimension_numbers<[1], [0], [0], [1], [0, 0, 1, 1], [], []>} : vector<256x16xbf16>, vector<16x8xbf16>, vector<256x8xf32> -> vector<256x8xf32>
    %cst_6 = arith.constant 0.000000e+00 : f32
    %13 = vector.broadcast %cst_6 : f32 to vector<256x8xf32>
    %14 = arith.maximumf %12, %13 : vector<256x8xf32>
    %c0_7 = arith.constant 0 : index
    %c0_8 = arith.constant 0 : index
    %c0_9 = arith.constant 0 : index
    %c0_10 = arith.constant 0 : index
    %15 = vector.load %arg4[%c0_7, %c0_8, %c0_9, %c0_10] : memref<1x1x256x8xf32, #tpu.memory_space<vmem>>, vector<1x1x256x8xf32>
    %16 = vector.shape_cast %15 : vector<1x1x256x8xf32> to vector<256x8xf32>
    %17 = vector.shape_cast %14 : vector<256x8xf32> to vector<1x1x256x8xf32>
    tpu.vector_store %arg4[%c0_7, %c0_8, %c0_9, %c0_10], %17 {strides = array<i32>} : memref<1x1x256x8xf32, #tpu.memory_space<vmem>>, vector<1x1x256x8xf32>,
    return
  }
  func.func @transform_0(%arg0: i32, %arg1: i32) -> (i32, i32, i32, i32) {
    %c0_i32 = arith.constant 0 : i32
    %c0_i32_0 = arith.constant 0 : i32
    %c0_i32_1 = arith.constant 0 : i32
    %c0_i32_2 = arith.constant 0 : i32
    return %arg0, %c0_i32, %c0_i32_0, %c0_i32_1 : i32, i32, i32, i32
  }
  func.func @transform_1(%arg0: i32, %arg1: i32) -> (i32, i32, i32) {
    %c0_i32 = arith.constant 0 : i32
    %c0_i32_0 = arith.constant 0 : i32
    %c0_i32_1 = arith.constant 0 : i32
    return %arg1, %c0_i32, %c0_i32_0 : i32, i32, i32
  }
  func.func @transform_2(%arg0: i32, %arg1: i32) -> (i32, i32, i32, i32) {
    %c0_i32 = arith.constant 0 : i32
    %c0_i32_0 = arith.constant 0 : i32
    %c0_i32_1 = arith.constant 0 : i32
    return %arg0, %arg1, %c0_i32, %c0_i32_0 : i32, i32, i32, i32
  }
}

</mosaic_0001>

<bundles_post_ra>
// kernel: tpu_custom_call.1
= control target key start
LH: loop header
LB: loop body
LE: loop exit
PB: predicated region body
PF: predicated region fallthrough
CT: control target
= control target key end

     0   :  { %s1393_s9 = smov 0   ;;  %s1395_s10 = smov 0   ;;  %s1809_s0 = inlined_call_operand.vmem [shape: bf16[2,17,17,4], index: 0, kind: input, shape index: {}]   ;;  %s1810_s1 = inlined_call_operand.vmem [shape: bf16[4,16,8], index: 1, kind: input, shape index: {}]   ;;  %s1811_s2 = inlined_call_operand.vmem [shape: f32[2,4,256,8], index: 2, kind: output, shape index: {}]  }
   0x1   :  { %s1397_s11 = smov 0   ;;  %s1399_s12 = smov 0  }
   0x2   :  { %s1401_s13 = smov 0  }
   0x3 LB: > { %s21_s14 = sadd.s32 1, %s1365_s11  ;;  %s24_s15 = sadd.s32 1, %s1369_s12  ;;  %s1373_s13 = sphi %s1401_s13, %s12_s13   ;;  %s1369_s12 = sphi %s1399_s12, %s1815_s12   ;;  %s1365_s11 = sphi %s1397_s11, %s1814_s11   ;;  %s1361_s10 = sphi %s1395_s10, %s1813_s10   ;;  %s1357_s9 = sphi %s1393_s9, %s1812_s9  }
   0x4   : > { %p22_p0 = scmp.ge.s32.totalorder %s21_s14, 4  ;;  %p1142_p1 = scmp.ge.s32.totalorder %s1373_s13, 1 }
   0x5   : > { %p136_p2 = scmp.lt.s32.totalorder %s1373_s13, 9 }
   0x6   : > { %s1817_s14 = smov (%p22_p0, %s21_s14), 0  ;;  %s1819_s15 = smov (!%p22_p0, %s24_s15), %s1369_s12 }
   0x7   : > { %p137_p3 = pnand %p1142_p1, %p136_p2  ;;  %p26_p4 = scmp.ge.s32.totalorder %s1819_s15, 2 }
   0x8   : > { %p167_p5 = scmp.lt.s32.totalorder (!%p137_p3), %s1361_s10, 1  ;;  %vm366_vm0 = vsmask.f32 (!%p137_p3), 7424  ;;  %s1375_s20 = smov (!%p137_p3), 8   ;;  %vm675_vm1 = vcmask (!%p137_p3), 31744   ;;  %vm708_vm2 = vcmask (!%p137_p3), 64512  }
   0x9   : > { %s1821_s15 = smov (%p26_p4, %s1819_s15), 0  ;;  %140 = sbr.rel (%p137_p3) target bundleno = 448 (0x1c0), region = 28 }
   0xa   : > { %s1376_s21 = smov (!%p137_p3), 4   ;;  %s1377_s22 = smov (!%p137_p3), 12   ;;  %vm741_vm3 = vcmask (!%p137_p3), 97280   ;;  %vm782_vm4 = vcmask (!%p137_p3), 130048  }
   0xb   : > { %p172_p6 = scmp.lt.s32.totalorder (!%p137_p3), %s1357_s9, 3 }
  0x10   : > { %s1823_s10 = smov (!%p167_p5, %s1361_s10), 1  ;;  %s1825_s9 = smov (!%p172_p6, %s1357_s9), 3 }
  0x11   : > { %s1256_s16 = smul.u32 204, %s1823_s10  ;;  %s1147_s23 = sshll.u32 %s1823_s10, 7 }
  0x12   : > { %s1202_s24 = sshll.u32 %s1825_s9, 3  ;;  %s1146_s25 = sshll.u32 %s1825_s9, 5 }
  0x13   : > { %s1431_s19 = scalar_lea.vmem %s1809_s0, %s1256_s16  ;;  %s176_s28 = scalar_lea.vmem %s1810_s1, %s1202_s24 }
  0x14   : > { %v1434_v0 = vld [vmem:[%s1431_s19 + $0x6c] sm:$0xff]   ;;  %v1442_v2 = vld [vmem:[%s1431_s19 + $0x78] sm:$0xff]   ;;  %v1304_v6 = vld [vmem:[%s1431_s19 + $0x14] ss:$0 sps:$4 sm:$0x11]   ;;  %s1586_s29 = sadd.s32 %s1147_s23, %s1146_s25 }
  0x15   : > { %v1437_v1 = vld [vmem:[%s1431_s19 + $0xc] sm:$0xff]   ;;  %612 = vrot.lane.b32.xlu1 %v1434_v0, %s1375_s20  ;;  %v476_v3 = vshrl.u32 %v1434_v0, 16  ;;  %v1448_v4 = vld [vmem:[%s1431_s19 + $0x18] sm:$0xff]   ;;  %v387_v9 = vshll.u32 %v1304_v6, 16  ;;  %v1456_v10 = vld [vmem:[%s1431_s19] sm:$0xff]   ;;  %v478_v13 = vshll.u32 %v1434_v0, 16 }
  0x16   : > { %596 = vrot.lane.b32.xlu0 %v1437_v1, %s1375_s20  ;;  %v380_v5 = vshrl.u32 %v1437_v1, 16  ;;  %v382_v7 = vshll.u32 %v1437_v1, 16  ;;  %v1306_v11 = vld [vmem:[%s1431_s19 + $0x8] ss:$0 sps:$4 sm:$0x11]   ;;  %v368_v16 = vshrl.u32 %v1456_v10, 16 }
  0x17   : > { %v1307_v12 = vld [vmem:[%s1431_s19 + $0x74] ss:$0 sps:$4 sm:$0x11]   ;;  %v389_v15 = vrot.slane %v387_v9, 1  ;;  %v370_v17 = vshll.u32 %v1456_v10, 16  ;;  %v1466_v18 = vld [vmem:[%s1431_s19 + $0x60] sm:$0xff]  }
  0x18   : > { %v384_v8 = vrot.slane %v382_v7, 1  ;;  %v375_v19 = vshll.u32 %v1306_v11, 16  ;;  %v480_v20 = vrot.slane %v478_v13, 1  ;;  %v483_v21 = vshll.u32 %v1307_v12, 16  ;;  %v1474_v30 = vld [vmem:[%s1431_s19 + $0x84] sm:$0xff]   ;;  %v1510_v11 = vld [vmem:[%s1431_s19 + $0x30] sm:$0xff]  }
  0x19   : > { %614 = vrot.lane.b32.xlu1 %v1442_v2, %s1375_s20  ;;  %v488_v22 = vshrl.u32 %v1442_v2, 16  ;;  %v372_v24 = vrot.slane %v370_v17, 1  ;;  %v1309_v25 = vld [vmem:[%s1431_s19 + $0x68] ss:$0 sps:$4 sm:$0x11]   ;;  %v464_v29 = vshrl.u32 %v1466_v18, 16 }
  0x1a   : > { %598 = vrot.lane.b32.xlu0 %v1448_v4, %s1375_s20  ;;  %v385_v14 = vor.u32 %v384_v8, %v380_v5  ;;  %v377_v26 = vrot.slane %v375_v19, 1  ;;  %v481_v27 = vor.u32 %v480_v20, %v476_v3  ;;  %v485_v28 = vrot.slane %v483_v21, 1  ;;  %v1310_v34 = vld [vmem:[%s1431_s19 + $0x80] ss:$0 sps:$4 sm:$0x11]   ;;  %v1487_v46 = vld [vmem:[%s1431_s19 + $0x24] sm:$0xff]  }
  0x1b   : > { %v373_v31 = vor.u32 %v372_v24, %v368_v16  ;;  %v466_v32 = vshll.u32 %v1466_v18, 16  ;;  %v471_v33 = vshll.u32 %v1309_v25, 16  ;;  %v490_v35 = vshll.u32 %v1442_v2, 16  ;;  %v1311_v37 = vld [vmem:[%s1431_s19 + $0x20] ss:$0 sps:$4 sm:$0x11]  }
  0x1c   : > { %v390_v23 = vsel %vm366_vm0, %v385_v14, %v389_v15  ;;  %v486_v36 = vsel %vm366_vm0, %v481_v27, %v485_v28  ;;  %v392_v38 = vshrl.u32 %v1448_v4, 16  ;;  %v495_v43 = vshll.u32 %v1310_v34, 16  ;;  %v1313_v49 = vld [vmem:[%s1431_s19 + $0x8c] ss:$0 sps:$4 sm:$0x11]   ;;  %v1506_v8 = vld [vmem:[%s1431_s19 + $0x90] sm:$0xff]  }
  0x1d   : > { %561 = vrot.lane.b32.xlu1 %v390_v23, %s1376_s21  ;;  %v378_v39 = vsel %vm366_vm0, %v373_v31, %v377_v26  ;;  %v468_v40 = vrot.slane %v466_v32, 1  ;;  %v473_v41 = vrot.slane %v471_v33, 1  ;;  %v492_v42 = vrot.slane %v490_v35, 1  ;;  %v1315_v57 = vld [vmem:[%s1431_s19 + $0x2c] ss:$0 sps:$4 sm:$0x11]  }
  0x1e   : > { %559 = vrot.lane.b32.xlu0 %v378_v39, %s1376_s21  ;;  %v394_v44 = vshll.u32 %v1448_v4, 16  ;;  %v399_v45 = vshll.u32 %v1311_v37, 16  ;;  %v502_v50 = vshll.u32 %v1474_v30, 16  ;;  %v497_v51 = vrot.slane %v495_v43, 1  ;;  %v1515_v13 = vld [vmem:[%s1431_s19 + $0x9c] sm:$0xff]   ;;  %v1534_v32 = vld [vmem:[%s1431_s19 + $0xb4] sm:$0xff]  }
  0x1f   : > { %v469_v47 = vor.u32 %v468_v40, %v464_v29  ;;  %v493_v48 = vor.u32 %v492_v42, %v488_v22  ;;  %v500_v55 = vshrl.u32 %v1474_v30, 16  ;;  %v507_v60 = vshll.u32 %v1313_v49, 16  ;;  %v1318_v9 = vld [vmem:[%s1431_s19 + $0x98] ss:$0 sps:$4 sm:$0x11]   ;;  %s1148_s30 = sshll.u32 %s1586_s29, 3 }
  0x20   : > { %v396_v52 = vrot.slane %v394_v44, 1  ;;  %v401_v54 = vrot.slane %v399_v45, 1  ;;  %v504_v56 = vrot.slane %v502_v50, 1  ;;  %v406_v61 = vshll.u32 %v1487_v46, 16  ;;  %v1553_v45 = vld [vmem:[%s1431_s19 + $0x3c] sm:$0xff]   ;;  %s1728_s5 = scalar_lea.vmem %s1811_s2, %s1148_s30 }
  0x21   : > { %577 = vrot.lane.b32.xlu1 %v486_v36, %s1376_s21  ;;  %v1492_v53 = vsel %vm366_vm0, %v469_v47, %v473_v41  ;;  %v498_v58 = vsel %vm366_vm0, %v493_v48, %v497_v51  ;;  %v404_v62 = vshrl.u32 %v1487_v46, 16  ;;  %v411_v63 = vshll.u32 %v1315_v57, 16  ;;  %v1319_v19 = vld [vmem:[%s1431_s19 + $0x38] ss:$0 sps:$4 sm:$0x11]  }
  0x22   : > { %575 = vrot.lane.b32.xlu0 %v1492_v53, %s1376_s21  ;;  %v397_v59 = vor.u32 %v396_v52, %v392_v38  ;;  %v505_v5 = vor.u32 %v504_v56, %v500_v55  ;;  %v509_v6 = vrot.slane %v507_v60, 1  ;;  %v408_v7 = vrot.slane %v406_v61, 1  ;;  %v1327_v33 = vld [vmem:[%s1431_s19 + $0x50] ss:$0 sps:$4 sm:$0x11]  }
  0x23   : > { %v413_v12 = vrot.slane %v411_v63, 1  ;;  %v514_v16 = vshll.u32 %v1506_v8, 16  ;;  %v519_v17 = vshll.u32 %v1318_v9, 16  ;;  %v418_v20 = vshll.u32 %v1510_v11, 16 }
  0x24   : > { %v402_v3 = vsel %vm366_vm0, %v397_v59, %v401_v54  ;;  %v510_v14 = vsel %vm366_vm0, %v505_v5, %v509_v6  ;;  %v409_v15 = vor.u32 %v408_v7, %v404_v62  ;;  %v512_v21 = vshrl.u32 %v1506_v8, 16  ;;  %v1329_v42 = vld [vmem:[%s1431_s19 + $0xbc] ss:$0 sps:$4 sm:$0x11]   ;;  %v1562_v54 = vld [vmem:[%s1431_s19 + $0xc0] sm:$0xff]  }
  0x25   : > { %659 = vrot.lane.b32.xlu1 %v486_v36, %s1377_s22  ;;  %v526_v22 = vshll.u32 %v1515_v13, 16  ;;  %v516_v25 = vrot.slane %v514_v16, 1  ;;  %v416_v26 = vshrl.u32 %v1510_v11, 16  ;;  %v524_v27 = vshrl.u32 %v1515_v13, 16  ;;  %v1540_v36 = vld [vmem:[%s1431_s19 + $0x54] sm:$0xff]  }
  0x26   : > { %643 = vrot.lane.b32.xlu0 %v390_v23, %s1377_s22  ;;  %v1526_v23 = vld [vmem:[%s1431_s19 + $0x48] sm:$0xff]   ;;  %v1529_v24 = vsel %vm366_vm0, %v409_v15, %v413_v12  ;;  %v521_v28 = vrot.slane %v519_v17, 1  ;;  %v420_v29 = vrot.slane %v418_v20, 1  ;;  %v423_v31 = vshll.u32 %v1319_v19, 16 }
  0x27   : > { %v440_v34 = vshrl.u32 %v1526_v23, 16  ;;  %v442_v35 = vshll.u32 %v1526_v23, 16  ;;  %v528_v37 = vrot.slane %v526_v22, 1  ;;  %v447_v39 = vshll.u32 %v1327_v33, 16  ;;  %v1334_v22 = vld [vmem:[%s176_s28] sm:$0xff]  }
  0x28   : > { %v548_v40 = vshrl.u32 %v1534_v32, 16  ;;  %v550_v41 = vshll.u32 %v1534_v32, 16  ;;  %v452_v43 = vshrl.u32 %v1540_v36, 16  ;;  %v1321_v44 = vld [vmem:[%s1431_s19 + $0xa4] ss:$0 sps:$4 sm:$0x11]   ;;  %v517_v55 = vor.u32 %v516_v25, %v512_v21  ;;  %1220 = vmatprep.subr.bf16.mxu0 %v1334_v22  ;;  %1254 = vmatprep.subr.bf16.mxu1 %v1334_v22 }
  0x29   : > { %661 = vrot.lane.b32.xlu1 %v498_v58, %s1377_s22  ;;  %v444_v38 = vrot.slane %v442_v35, 1  ;;  %v449_v48 = vrot.slane %v447_v39, 1  ;;  %v555_v50 = vshll.u32 %v1329_v42, 16  ;;  %v1331_v51 = vld [vmem:[%s1431_s19 + $0x5c] ss:$0 sps:$4 sm:$0x11]   ;;  %v421_v62 = vor.u32 %v420_v29, %v416_v26  ;;  %1221 = vmatpush3.bf16.msra.mxu0 %v1334_v22 }
  0x2a   : > { %645 = vrot.lane.b32.xlu0 %v402_v3, %s1377_s22  ;;  %v552_v49 = vrot.slane %v550_v41, 1  ;;  %v454_v52 = vshll.u32 %v1540_v36, 16  ;;  %v459_v60 = vshll.u32 %v1331_v51, 16  ;;  %v634_v61 = vshll.u32 %v1562_v54, 16  ;;  %1255 = vmatpush3.bf16.msra.mxu1 %v1334_v22 }
  0x2b   : > { %v445_v47 = vor.u32 %v444_v38, %v440_v34  ;;  %v425_v63 = vrot.slane %v423_v31, 1  ;;  %v632_v5 = vshrl.u32 %v1562_v54, 16  ;;  %v522_v15 = vsel %vm366_vm0, %v517_v55, %v521_v28  ;;  %v1323_v17 = vld [vmem:[%s1431_s19 + $0x44] ss:$0 sps:$4 sm:$0x11]  }
  0x2c   : > { %v553_v57 = vor.u32 %v552_v49, %v548_v40  ;;  %v456_v59 = vrot.slane %v454_v52, 1  ;;  %v461_v9 = vrot.slane %v459_v60, 1  ;;  %v636_v12 = vrot.slane %v634_v61, 1  ;;  %v1326_v40 = vld [vmem:[%s1431_s19 + $0xb0] ss:$0 sps:$4 sm:$0x11]  }
  0x2d   : > { %579 = vrot.lane.b32.xlu1 %v498_v58, %s1376_s21  ;;  %v1565_v56 = vsel %vm366_vm0, %v445_v47, %v449_v48  ;;  %v557_v58 = vrot.slane %v555_v50, 1  ;;  %v531_v16 = vshll.u32 %v1321_v44, 16  ;;  %v430_v19 = vshll.u32 %v1553_v45, 16 }
  0x2e   : > { %563 = vrot.lane.b32.xlu0 %v402_v3, %s1376_s21  ;;  %v1333_v3 = vld [vmem:[%s1431_s19 + $0xc8] ss:$0 sps:$4 sm:$0x11]   ;;  %v457_v7 = vor.u32 %v456_v59, %v452_v43  ;;  %v637_v21 = vor.u32 %v636_v12, %v632_v5  ;;  %v426_v26 = vsel %vm366_vm0, %v421_v62, %v425_v63  ;;  %v529_v28 = vor.u32 %v528_v37, %v524_v27 }
  0x2f   : > { %v1578_v6 = vsel %vm366_vm0, %v553_v57, %v557_v58  ;;  %v639_v20 = vshll.u32 %v1333_v3, 16  ;;  %v428_v29 = vshrl.u32 %v1553_v45, 16  ;;  %v533_v31 = vrot.slane %v531_v16, 1  ;;  %v1601_v37 = vld [vmem:[%s1431_s19 + $0xa8] sm:$0xff]  }
  0x30   : > { %v432_v33 = vrot.slane %v430_v19, 1  ;;  %v435_v34 = vshll.u32 %v1323_v17, 16  ;;  %v538_v41 = vshll.u32 %v1601_v37, 16  ;;  %v536_v42 = vshrl.u32 %v1601_v37, 16 }
  0x31   : > { %581 = vrot.lane.b32.xlu1 %v510_v14, %s1376_s21  ;;  %v641_v25 = vrot.slane %v639_v20, 1  ;;  %v543_v44 = vshll.u32 %v1326_v40, 16 }
  0x32   : > { %565 = vrot.lane.b32.xlu0 %v1529_v24, %s1376_s21  ;;  %v433_v38 = vor.u32 %v432_v33, %v428_v29  ;;  %v437_v27 = vrot.slane %v435_v34, 1  ;;  %v540_v43 = vrot.slane %v538_v41, 1 }
  0x33   : > { %v642_v35 = vsel %vm366_vm0, %v637_v21, %v641_v25  ;;  %v545_v48 = vrot.slane %v543_v44, 1 }
  0x34   : > { %v438_v39 = vsel %vm366_vm0, %v433_v38, %v437_v27  ;;  %v541_v47 = vor.u32 %v540_v43, %v536_v42 }
  0x35   : > { %616 = vrot.lane.b32.xlu1 %v1474_v30, %s1375_s20 }
  0x36   : > { %600 = vrot.lane.b32.xlu0 %v1487_v46, %s1375_s20  ;;  %v546_v49 = vsel %vm366_vm0, %v541_v47, %v545_v48 }
  0x39   : > { %618 = vrot.lane.b32.xlu1 %v1506_v8, %s1375_s20 }
  0x3a   : > { %602 = vrot.lane.b32.xlu0 %v1510_v11, %s1375_s20 }
  0x3d   : > { %663 = vrot.lane.b32.xlu1 %v510_v14, %s1377_s22  ;;  %v462_v14 = vsel %vm366_vm0, %v457_v7, %v461_v9 }
  0x3e   : > { %647 = vrot.lane.b32.xlu0 %v1529_v24, %s1377_s22  ;;  %v534_v24 = vsel %vm366_vm0, %v529_v28, %v533_v31 }
  0x41   : > { %665 = vrot.lane.b32.xlu1 %v522_v15, %s1377_s22 }
  0x42   : > { %649 = vrot.lane.b32.xlu0 %v426_v26, %s1377_s22 }
  0x45   : > { %583 = vrot.lane.b32.xlu1 %v522_v15, %s1376_s21 }
  0x46   : > { %567 = vrot.lane.b32.xlu0 %v426_v26, %s1376_s21 }
  0x49   : > { %585 = vrot.lane.b32.xlu1 %v534_v24, %s1376_s21 }
  0x4a   : > { %569 = vrot.lane.b32.xlu0 %v438_v39, %s1376_s21 }
  0x4d   : > { %620 = vrot.lane.b32.xlu1 %v1515_v13, %s1375_s20 }
  0x4e   : > { %604 = vrot.lane.b32.xlu0 %v1553_v45, %s1375_s20 }
  0x51   : > { %622 = vrot.lane.b32.xlu1 %v1601_v37, %s1375_s20 }
  0x52   : > { %606 = vrot.lane.b32.xlu0 %v1526_v23, %s1375_s20 }
  0x55   : > { %667 = vrot.lane.b32.xlu1 %v534_v24, %s1377_s22 }
  0x56   : > { %651 = vrot.lane.b32.xlu0 %v438_v39, %s1377_s22 }
  0x59   : > { %669 = vrot.lane.b32.xlu1 %v546_v49, %s1377_s22 }
  0x5a   : > { %653 = vrot.lane.b32.xlu0 %v1565_v56, %s1377_s22 }
  0x5d   : > { %587 = vrot.lane.b32.xlu1 %v546_v49, %s1376_s21 }
  0x5e   : > { %571 = vrot.lane.b32.xlu0 %v1565_v56, %s1376_s21 }
  0x61   : > { %589 = vrot.lane.b32.xlu1 %v1578_v6, %s1376_s21 }
  0x62   : > { %573 = vrot.lane.b32.xlu0 %v462_v14, %s1376_s21 }
  0x65   : > { %624 = vrot.lane.b32.xlu1 %v1534_v32, %s1375_s20 }
  0x66   : > { %608 = vrot.lane.b32.xlu0 %v1540_v36, %s1375_s20 }
  0x69   : > { %626 = vrot.lane.b32.xlu1 %v1562_v54, %s1375_s20 }
  0x6a   : > { %610 = vrot.lane.b32.xlu0 %v1466_v18, %s1375_s20 }
  0x6d   : > { %671 = vrot.lane.b32.xlu1 %v1578_v6, %s1377_s22 }
  0x6e   : > { %655 = vrot.lane.b32.xlu0 %v462_v14, %s1377_s22 }
  0x71   : > { %673 = vrot.lane.b32.xlu1 %v642_v35, %s1377_s22 }
  0x72   : > { %657 = vrot.lane.b32.xlu0 %v1492_v53, %s1377_s22 }
  0x87   : > { %v613_v50 = vpop.permute.xlu1 %612 }
  0x88   : > { %v597_v51 = vpop.permute.xlu0 %596 }
  0x8b   : > { %v615_v52 = vpop.permute.xlu1 %614 }
  0x8c   : > { %v599_v55 = vpop.permute.xlu0 %598 }
  0x8f   : > { %v562_v56 = vpop.permute.xlu1 %561 }
  0x90   : > { %v560_v57 = vpop.permute.xlu0 %559 }
  0x91   : > { %v677_v60 = vsel %vm675_vm1, %v1456_v10, %v560_v57  ;;  %v679_v10 = vsel %vm675_vm1, %v1437_v1, %v562_v56 }
  0x92   : > { %v710_v5 = vsel %vm708_vm2, %v677_v60, %v597_v51  ;;  %v712_v9 = vsel %vm708_vm2, %v679_v10, %v599_v55 }
  0x93   : > { %v578_v54 = vpop.permute.xlu1 %577 }
  0x94   : > { %v576_v58 = vpop.permute.xlu0 %575  ;;  %v695_v61 = vsel %vm675_vm1, %v1434_v0, %v578_v54 }
  0x95   : > { %v693_v53 = vsel %vm675_vm1, %v1466_v18, %v576_v58  ;;  %v728_v6 = vsel %vm708_vm2, %v695_v61, %v615_v52 }
  0x96   : > { %v726_v62 = vsel %vm708_vm2, %v693_v53, %v613_v50 }
  0x97   : > { %v660_v59 = vpop.permute.xlu1 %659 }
  0x98   : > { %v759_v63 = vsel %vm741_vm3, %v726_v62, %v660_v59  ;;  %v644_v3 = vpop.permute.xlu0 %643 }
  0x99   : > { %1238 = vmatprep.mubr.msk.bf16.mxu1 %vm782_vm4, %v759_v63  ;;  %v743_v0 = vsel %vm741_vm3, %v710_v5, %v644_v3 }
  0x9a   : > { %1222 = vmatprep.mubr.msk.bf16.mxu0 %vm782_vm4, %v743_v0 }
  0x9b   : > { %v662_v7 = vpop.permute.xlu1 %661 }
  0x9c   : > { %v761_v18 = vsel %vm741_vm3, %v728_v6, %v662_v7  ;;  %v646_v12 = vpop.permute.xlu0 %645 }
  0x9d   : > { %1239 = vmatmul.mubr.msk.bf16.vlgmr.msra.gmra.mrb[0].mxu1 %vm782_vm4, %v761_v18  ;;  %v745_v16 = vsel %vm741_vm3, %v712_v9, %v646_v12 }
  0x9e   : > { %1223 = vmatmul.mubr.msk.bf16.vlgmr.msra.gmra.mrb[0].mxu0 %vm782_vm4, %v745_v16 }
  0x9f   : > { %v580_v15 = vpop.permute.xlu1 %579 }
  0xa0   : > { %v564_v17 = vpop.permute.xlu0 %563  ;;  %v697_v22 = vsel %vm675_vm1, %v1442_v2, %v580_v15 }
  0xa1   : > { %v681_v31 = vsel %vm675_vm1, %v1448_v4, %v564_v17 }
  0xa3   : > { %v582_v19 = vpop.permute.xlu1 %581 }
  0xa4   : > { %v566_v20 = vpop.permute.xlu0 %565  ;;  %v699_v33 = vsel %vm675_vm1, %v1474_v30, %v582_v19 }
  0xa5   : > { %v683_v4 = vsel %vm675_vm1, %v1487_v46, %v566_v20 }
  0xa7   : > { %v617_v1 = vpop.permute.xlu1 %616 }
  0xa8   : > { %v601_v14 = vpop.permute.xlu0 %600  ;;  %v730_v25 = vsel %vm708_vm2, %v697_v22, %v617_v1 }
  0xa9   : > { %v714_v34 = vsel %vm708_vm2, %v681_v31, %v601_v14 }
  0xab   : > { %v619_v21 = vpop.permute.xlu1 %618 }
  0xac   : > { %v603_v26 = vpop.permute.xlu0 %602  ;;  %v732_v35 = vsel %vm708_vm2, %v699_v33, %v619_v21 }
  0xad   : > { %v716_v39 = vsel %vm708_vm2, %v683_v4, %v603_v26 }
  0xaf   : > { %v664_v28 = vpop.permute.xlu1 %663 }
  0xb0   : > { %v763_v29 = vsel %vm741_vm3, %v730_v25, %v664_v28  ;;  %v648_v24 = vpop.permute.xlu0 %647 }
  0xb1   : > { %1242 = vmatprep.mubr.msk.bf16.mxu1 %vm782_vm4, %v763_v29  ;;  %v747_v38 = vsel %vm741_vm3, %v714_v34, %v648_v24 }
  0xb2   : > { %1226 = vmatprep.mubr.msk.bf16.mxu0 %vm782_vm4, %v747_v38 }
  0xb3   : > { %v666_v2 = vpop.permute.xlu1 %665 }
  0xb4   : > { %v765_v27 = vsel %vm741_vm3, %v732_v35, %v666_v2  ;;  %v650_v30 = vpop.permute.xlu0 %649 }
  0xb5   : > { %1243 = vmatmul.mubr.msk.bf16.gmra.mrb[4].mxu1 %vm782_vm4, %v765_v27  ;;  %v749_v41 = vsel %vm741_vm3, %v716_v39, %v650_v30 }
  0xb6   : > { %1227 = vmatmul.mubr.msk.bf16.gmra.mrb[4].mxu0 %vm782_vm4, %v749_v41 }
  0xb7   : > { %v584_v40 = vpop.permute.xlu1 %583 }
  0xb8   : > { %v568_v42 = vpop.permute.xlu0 %567  ;;  %v701_v50 = vsel %vm675_vm1, %v1506_v8, %v584_v40 }
  0xb9   : > { %v685_v56 = vsel %vm675_vm1, %v1510_v11, %v568_v42 }
  0xbb   : > { %v586_v43 = vpop.permute.xlu1 %585 }
  0xbc   : > { %v570_v44 = vpop.permute.xlu0 %569  ;;  %v703_v57 = vsel %vm675_vm1, %v1515_v13, %v586_v43 }
  0xbd   : > { %v687_v11 = vsel %vm675_vm1, %v1553_v45, %v570_v44 }
  0xbf   : > { %v621_v47 = vpop.permute.xlu1 %620 }
  0xc0   : > { %v605_v48 = vpop.permute.xlu0 %604  ;;  %v734_v51 = vsel %vm708_vm2, %v701_v50, %v621_v47 }
  0xc1   : > { %v718_v54 = vsel %vm708_vm2, %v685_v56, %v605_v48 }
  0xc3   : > { %v623_v49 = vpop.permute.xlu1 %622 }
  0xc4   : > { %v607_v46 = vpop.permute.xlu0 %606  ;;  %v736_v58 = vsel %vm708_vm2, %v703_v57, %v623_v49 }
  0xc5   : > { %v720_v53 = vsel %vm708_vm2, %v687_v11, %v607_v46 }
  0xc7   : > { %v668_v52 = vpop.permute.xlu1 %667 }
  0xc8   : > { %v767_v55 = vsel %vm741_vm3, %v734_v51, %v668_v52  ;;  %v652_v59 = vpop.permute.xlu0 %651 }
  0xc9   : > { %1246 = vmatprep.mubr.msk.bf16.mxu1 %vm782_vm4, %v767_v55  ;;  %v751_v60 = vsel %vm741_vm3, %v718_v54, %v652_v59 }
  0xca   : > { %1230 = vmatprep.mubr.msk.bf16.mxu0 %vm782_vm4, %v751_v60 }
  0xcb   : > { %v670_v8 = vpop.permute.xlu1 %669 }
  0xcc   : > { %v769_v61 = vsel %vm741_vm3, %v736_v58, %v670_v8  ;;  %v654_v13 = vpop.permute.xlu0 %653 }
  0xcd   : > { %1247 = vmatmul.mubr.msk.bf16.gmra.mrb[8].mxu1 %vm782_vm4, %v769_v61  ;;  %v753_v63 = vsel %vm741_vm3, %v720_v53, %v654_v13 }
  0xce   : > { %1231 = vmatmul.mubr.msk.bf16.gmra.mrb[8].mxu0 %vm782_vm4, %v753_v63 }
  0xcf   : > { %v588_v62 = vpop.permute.xlu1 %587 }
  0xd0   : > { %v572_v3 = vpop.permute.xlu0 %571  ;;  %v705_v18 = vsel %vm675_vm1, %v1601_v37, %v588_v62 }
  0xd1   : > { %v689_v16 = vsel %vm675_vm1, %v1526_v23, %v572_v3 }
  0xd3   : > { %v590_v5 = vpop.permute.xlu1 %589 }
  0xd4   : > { %v574_v6 = vpop.permute.xlu0 %573  ;;  %v707_v17 = vsel %vm675_vm1, %v1534_v32, %v590_v5 }
  0xd5   : > { %v691_v23 = vsel %vm675_vm1, %v1540_v36, %v574_v6 }
  0xd7   : > { %v625_v7 = vpop.permute.xlu1 %624 }
  0xd8   : > { %v609_v10 = vpop.permute.xlu0 %608  ;;  %v738_v9 = vsel %vm708_vm2, %v705_v18, %v625_v7 }
  0xd9   : > { %v722_v19 = vsel %vm708_vm2, %v689_v16, %v609_v10 }
  0xdb   : > { %v627_v0 = vpop.permute.xlu1 %626 }
  0xdc   : > { %v611_v45 = vpop.permute.xlu0 %610  ;;  %v740_v20 = vsel %vm708_vm2, %v707_v17, %v627_v0 }
  0xdd   : > { %v724_v22 = vsel %vm708_vm2, %v691_v23, %v611_v45 }
  0xdf   : > { %v672_v12 = vpop.permute.xlu1 %671 }
  0xe0   : > { %v771_v15 = vsel %vm741_vm3, %v738_v9, %v672_v12  ;;  %v656_v37 = vpop.permute.xlu0 %655 }
  0xe1   : > { %1250 = vmatprep.mubr.msk.bf16.mxu1 %vm782_vm4, %v771_v15  ;;  %v755_v14 = vsel %vm741_vm3, %v722_v19, %v656_v37 }
  0xe2   : > { %1234 = vmatprep.mubr.msk.bf16.mxu0 %vm782_vm4, %v755_v14 }
  0xe3   : > { %v674_v1 = vpop.permute.xlu1 %673 }
  0xe4   : > { %v773_v21 = vsel %vm741_vm3, %v740_v20, %v674_v1  ;;  %v658_v32 = vpop.permute.xlu0 %657 }
  0xe5   : > { %1251 = vmatmul.mubr.msk.bf16.gmra.mrb[12].mxu1 %vm782_vm4, %v773_v21  ;;  %v757_v25 = vsel %vm741_vm3, %v724_v22, %v658_v32 }
  0xe6   : > { %1235 = vmatmul.mubr.msk.bf16.gmra.mrb[12].mxu0 %vm782_vm4, %v757_v25 }
 0x170   : > { %v1240_v26 = vpop.f32.mrb[0].mxu1 }
 0x171   : > { %v994_v28 = vmax.f32 %v1240_v26, 0.0  ;;  %v913_v36 = vpop.f32.mrb[1].mxu1  ;;  %v1224_v35 = vpop.f32.mrb[0].mxu0 }
 0x172   : > { %v992_v29 = vmax.f32 %v913_v36, 0.0  ;;  %v1241_v31 = vpop.f32.mrb[2].mxu1  ;;  %v978_v2 = vmax.f32 %v1224_v35, 0.0  ;;  %v849_v38 = vpop.f32.mrb[1].mxu0 }
 0x173   : > { %1026 = vst.msk [vmem:[%s1728_s5 + $0x90] sm:$0xff] %vm708_vm2, %v994_v28  ;;  %v995_v33 = vmax.f32 %v1241_v31, 0.0  ;;  %v916_v34 = vpop.f32.mrb[3].mxu1  ;;  %v976_v27 = vmax.f32 %v849_v38, 0.0  ;;  %v1225_v4 = vpop.f32.mrb[2].mxu0 }
 0x174   : > { %1024 = vst.msk [vmem:[%s1728_s5 + $0x80] sm:$0xff] %vm708_vm2, %v992_v29  ;;  %v993_v24 = vmax.f32 %v916_v34, 0.0  ;;  %1010 = vst.msk [vmem:[%s1728_s5 + $0x10] sm:$0xff] %vm708_vm2, %v978_v2  ;;  %v979_v39 = vmax.f32 %v1225_v4, 0.0  ;;  %v852_v30 = vpop.f32.mrb[3].mxu0 }
 0x175   : > { %1027 = vst.msk [vmem:[%s1728_s5 + $0x98] sm:$0xff] %vm708_vm2, %v995_v33  ;;  %1008 = vst.msk [vmem:[%s1728_s5] sm:$0xff] %vm708_vm2, %v976_v27  ;;  %v977_v40 = vmax.f32 %v852_v30, 0.0 }
 0x176   : > { %1025 = vst.msk [vmem:[%s1728_s5 + $0x88] sm:$0xff] %vm708_vm2, %v993_v24  ;;  %1011 = vst.msk [vmem:[%s1728_s5 + $0x18] sm:$0xff] %vm708_vm2, %v979_v39 }
 0x177   : > { %1009 = vst.msk [vmem:[%s1728_s5 + $0x8] sm:$0xff] %vm708_vm2, %v977_v40 }
 0x188   : > { %v1244_v41 = vpop.f32.mrb[4].mxu1 }
 0x189   : > { %v998_v42 = vmax.f32 %v1244_v41, 0.0  ;;  %v929_v43 = vpop.f32.mrb[5].mxu1  ;;  %v1228_v50 = vpop.f32.mrb[4].mxu0 }
 0x18a   : > { %v996_v44 = vmax.f32 %v929_v43, 0.0  ;;  %v1245_v47 = vpop.f32.mrb[6].mxu1  ;;  %v982_v46 = vmax.f32 %v1228_v50, 0.0  ;;  %v865_v52 = vpop.f32.mrb[5].mxu0 }
 0x18b   : > { %1030 = vst.msk [vmem:[%s1728_s5 + $0xb0] sm:$0xff] %vm708_vm2, %v998_v42  ;;  %v999_v48 = vmax.f32 %v1245_v47, 0.0  ;;  %v932_v49 = vpop.f32.mrb[7].mxu1  ;;  %v980_v55 = vmax.f32 %v865_v52, 0.0  ;;  %v1229_v56 = vpop.f32.mrb[6].mxu0 }
 0x18c   : > { %1028 = vst.msk [vmem:[%s1728_s5 + $0xa0] sm:$0xff] %vm708_vm2, %v996_v44  ;;  %v997_v51 = vmax.f32 %v932_v49, 0.0  ;;  %1014 = vst.msk [vmem:[%s1728_s5 + $0x30] sm:$0xff] %vm708_vm2, %v982_v46  ;;  %v983_v57 = vmax.f32 %v1229_v56, 0.0  ;;  %v868_v54 = vpop.f32.mrb[7].mxu0 }
 0x18d   : > { %1031 = vst.msk [vmem:[%s1728_s5 + $0xb8] sm:$0xff] %vm708_vm2, %v999_v48  ;;  %1012 = vst.msk [vmem:[%s1728_s5 + $0x20] sm:$0xff] %vm708_vm2, %v980_v55  ;;  %v981_v58 = vmax.f32 %v868_v54, 0.0 }
 0x18e   : > { %1029 = vst.msk [vmem:[%s1728_s5 + $0xa8] sm:$0xff] %vm708_vm2, %v997_v51  ;;  %1015 = vst.msk [vmem:[%s1728_s5 + $0x38] sm:$0xff] %vm708_vm2, %v983_v57 }
 0x18f   : > { %1013 = vst.msk [vmem:[%s1728_s5 + $0x28] sm:$0xff] %vm708_vm2, %v981_v58 }
 0x1a0   : > { %v1248_v59 = vpop.f32.mrb[8].mxu1 }
 0x1a1   : > { %v1002_v8 = vmax.f32 %v1248_v59, 0.0  ;;  %v945_v60 = vpop.f32.mrb[9].mxu1  ;;  %v1232_v62 = vpop.f32.mrb[8].mxu0 }
 0x1a2   : > { %v1000_v61 = vmax.f32 %v945_v60, 0.0  ;;  %v1249_v11 = vpop.f32.mrb[10].mxu1  ;;  %v986_v3 = vmax.f32 %v1232_v62, 0.0  ;;  %v881_v5 = vpop.f32.mrb[9].mxu0 }
 0x1a3   : > { %1034 = vst.msk [vmem:[%s1728_s5 + $0xd0] sm:$0xff] %vm708_vm2, %v1002_v8  ;;  %v1003_v53 = vmax.f32 %v1249_v11, 0.0  ;;  %v948_v13 = vpop.f32.mrb[11].mxu1  ;;  %v984_v6 = vmax.f32 %v881_v5, 0.0  ;;  %v1233_v7 = vpop.f32.mrb[10].mxu0 }
 0x1a4   : > { %1032 = vst.msk [vmem:[%s1728_s5 + $0xc0] sm:$0xff] %vm708_vm2, %v1000_v61  ;;  %v1001_v63 = vmax.f32 %v948_v13, 0.0  ;;  %1018 = vst.msk [vmem:[%s1728_s5 + $0x50] sm:$0xff] %vm708_vm2, %v986_v3  ;;  %v987_v10 = vmax.f32 %v1233_v7, 0.0  ;;  %v884_v0 = vpop.f32.mrb[11].mxu0 }
 0x1a5   : > { %1035 = vst.msk [vmem:[%s1728_s5 + $0xd8] sm:$0xff] %vm708_vm2, %v1003_v53  ;;  %1016 = vst.msk [vmem:[%s1728_s5 + $0x40] sm:$0xff] %vm708_vm2, %v984_v6  ;;  %v985_v18 = vmax.f32 %v884_v0, 0.0 }
 0x1a6   : > { %1033 = vst.msk [vmem:[%s1728_s5 + $0xc8] sm:$0xff] %vm708_vm2, %v1001_v63  ;;  %1019 = vst.msk [vmem:[%s1728_s5 + $0x58] sm:$0xff] %vm708_vm2, %v987_v10 }
 0x1a7   : > { %1017 = vst.msk [vmem:[%s1728_s5 + $0x48] sm:$0xff] %vm708_vm2, %v985_v18 }
 0x1b8   : > { %v1252_v9 = vpop.f32.mrb[12].mxu1 }
 0x1b9   : > { %v1006_v45 = vmax.f32 %v1252_v9, 0.0  ;;  %v961_v12 = vpop.f32.mrb[13].mxu1  ;;  %v1236_v20 = vpop.f32.mrb[12].mxu0 }
 0x1ba   : > { %v1004_v15 = vmax.f32 %v961_v12, 0.0  ;;  %v1253_v16 = vpop.f32.mrb[14].mxu1  ;;  %v990_v1 = vmax.f32 %v1236_v20, 0.0  ;;  %v897_v14 = vpop.f32.mrb[13].mxu0 }
 0x1bb   : > { %1038 = vst.msk [vmem:[%s1728_s5 + $0xf0] sm:$0xff] %vm708_vm2, %v1006_v45  ;;  %v1007_v17 = vmax.f32 %v1253_v16, 0.0  ;;  %v964_v19 = vpop.f32.mrb[15].mxu1  ;;  %v988_v21 = vmax.f32 %v897_v14, 0.0  ;;  %v1237_v23 = vpop.f32.mrb[14].mxu0 }
 0x1bc   : > { %1036 = vst.msk [vmem:[%s1728_s5 + $0xe0] sm:$0xff] %vm708_vm2, %v1004_v15  ;;  %v1005_v37 = vmax.f32 %v964_v19, 0.0  ;;  %1022 = vst.msk [vmem:[%s1728_s5 + $0x70] sm:$0xff] %vm708_vm2, %v990_v1  ;;  %v991_v22 = vmax.f32 %v1237_v23, 0.0  ;;  %v900_v32 = vpop.f32.mrb[15].mxu0 }
 0x1bd   : > { %1039 = vst.msk [vmem:[%s1728_s5 + $0xf8] sm:$0xff] %vm708_vm2, %v1007_v17  ;;  %1020 = vst.msk [vmem:[%s1728_s5 + $0x60] sm:$0xff] %vm708_vm2, %v988_v21  ;;  %v989_v25 = vmax.f32 %v900_v32, 0.0 }
 0x1be   : > { %1037 = vst.msk [vmem:[%s1728_s5 + $0xe8] sm:$0xff] %vm708_vm2, %v1005_v37  ;;  %1023 = vst.msk [vmem:[%s1728_s5 + $0x78] sm:$0xff] %vm708_vm2, %v991_v22 }
 0x1bf   : > { %1021 = vst.msk [vmem:[%s1728_s5 + $0x68] sm:$0xff] %vm708_vm2, %v989_v25 }
 0x1c0 PF: > { %s12_s13 = sadd.s32 1, %s1373_s13   ;;  %s1812_s9 = smov %s1365_s11 }
 0x1c1   : > { %p9_p7 = scmp.ge.s32.totalorder %s12_s13, 10   ;;  %s1813_s10 = smov %s1369_s12 }
 0x1c2   : > { %s1814_s11 = smov %s1817_s14  ;;  %s1815_s12 = smov %s1821_s15 }
 0x1c3   :  { %11 = sbr.rel (!%p9_p7) target bundleno = 3 (0x3), region = 61 }

</bundles_post_ra>
